<compile_context>
chip_gen: v7x
topology: tpu7x:2x2x1
jax: 0.10.0
libtpu: 0.0.40
codegen_flags: <defaults>
</compile_context>

<pallas_src>
import jax
import jax.numpy as jnp
from jax.experimental import pallas as pl
from jax.experimental.pallas import tpu as pltpu


def _round_up(x: int, m: int) -> int:
    return ((x + m - 1) // m) * m


def _cdiv(a: int, b: int) -> int:
    return -(-a // b)


def _mxu_lane_align() -> int:
    """256 for the 2x256x256 MXUs (v6e/v7x); 128 for v5e / unknown."""
    try:
        kind = jax.devices()[0].device_kind.lower()
    except Exception:
        return 128
    return 256 if ("v6" in kind or "v7" in kind) else 128


# -----------------------------------------------------------------------------
# One-time parameter preparation (call once, store, reuse on every forward).
# -----------------------------------------------------------------------------
def prepare_params(w1, b1, w2, b2, *, compute_dtype=jnp.bfloat16, lane_align=None):
    """Transpose to [in, hid] / [hid, out], zero-pad the hidden axis to an
    MXU-friendly multiple and cast weights to the MXU compute dtype.

    w1: [hid, in], b1: [hid], w2: [out, hid], b2: [out]   (PyTorch layout)
    Returns (w1_p [in, hid_p] bf16, b1_p [1, hid_p] f32,
             w2_p [hid_p, out] bf16, b2_p [1, out] f32).
    """
    if lane_align is None:
        lane_align = _mxu_lane_align()
    hid, in_size = w1.shape
    out_size = w2.shape[0]
    hid_p = _round_up(hid, lane_align)

    w1_t = jnp.asarray(w1, jnp.float32).T.astype(compute_dtype)       # [in, hid]
    w2_t = jnp.asarray(w2, jnp.float32).T.astype(compute_dtype)       # [hid, out]
    w1_p = jnp.zeros((in_size, hid_p), compute_dtype).at[:, :hid].set(w1_t)
    w2_p = jnp.zeros((hid_p, out_size), compute_dtype).at[:hid, :].set(w2_t)
    b1_p = jnp.zeros((1, hid_p), jnp.float32).at[0, :hid].set(
        jnp.asarray(b1, jnp.float32))
    b2_p = jnp.asarray(b2, jnp.float32).reshape(1, out_size)
    return w1_p, b1_p, w2_p, b2_p


# -----------------------------------------------------------------------------
# Kernel
# -----------------------------------------------------------------------------
def _qnet_kernel(x_ref, w1_ref, b1_ref, w2_ref, b2_ref, o_ref):
    # Cast x to the MXU dtype in-kernel (VPU) -- no wrapper-side pad/cast pass.
    x = x_ref[...].astype(w1_ref.dtype)
    # Layer 1: (tb, in) @ (in, hid_p) on the MXU, f32 accumulation.
    h = jnp.dot(x, w1_ref[...], preferred_element_type=jnp.float32)
    h = jnp.maximum(h + b1_ref[...], 0.0)                  # bias + ReLU in f32
    # Layer 2: (tb, hid_p) @ (hid_p, out) on the MXU, f32 accumulation.
    out = jnp.dot(h.astype(w2_ref.dtype), w2_ref[...],
                  preferred_element_type=jnp.float32)
    o_ref[...] = (out + b2_ref[...]).astype(o_ref.dtype)


def _choose_batch_tile(B, per_row_bytes, resident_bytes, budget_bytes):
    """VMEM-budgeted batch tile: 16-row granularity, >=2 grid steps when large."""
    if B <= 16:
        return B, 1                        # block dim == array dim: always legal
    avail = max(budget_bytes - resident_bytes, 16 * per_row_bytes)
    tb_cap = int(max(16, min((avail // per_row_bytes) // 16 * 16, 2048)))
    # >=2 steps so v7x's two TensorCores split the batch; size the tile to
    # ~ceil(B/steps) so the last (partial) tile carries little pad waste.
    steps = max(2, _cdiv(B, tb_cap))
    tb = min(tb_cap, _round_up(_cdiv(B, steps), 16))
    return tb, _cdiv(B, tb)


def linear_qnet_forward(x, params, *, out_dtype=jnp.float32,
                        vmem_budget_bytes=24 << 20):
    """relu(x @ W1.T + b1) @ W2.T + b2, with params from prepare_params()."""
    w1_p, b1_p, w2_p, b2_p = params
    squeeze = (x.ndim == 1)
    if squeeze:
        x = x[None, :]
    B, in_size = x.shape
    assert in_size == w1_p.shape[0], "x feature dim mismatch vs prepared W1"
    hid_p = w1_p.shape[1]
    out_size = w2_p.shape[1]

    w_item = jnp.dtype(w1_p.dtype).itemsize
    x_item = jnp.dtype(x.dtype).itemsize
    o_item = jnp.dtype(out_dtype).itemsize
    resident = (w1_p.size + w2_p.size) * w_item + (b1_p.size + b2_p.size) * 4
    per_row = (2 * in_size * x_item              # x double buffer
               + 2 * out_size * o_item           # out double buffer
               + hid_p * (4 + w_item)            # f32 intermediate + bf16 copy
               + in_size * w_item + out_size * 4)  # temporaries / headroom
    tb, steps = _choose_batch_tile(B, per_row, resident, vmem_budget_bytes)

    vmem_need = resident + tb * per_row
    vmem_limit = int(min(max(vmem_need + (4 << 20), 32 << 20), 48 << 20))

    cost = pl.CostEstimate(
        flops=2 * B * (in_size * hid_p + hid_p * out_size),
        transcendentals=0,
        bytes_accessed=(B * in_size * x_item + resident + B * out_size * o_item),
    )

    out = pl.pallas_call(
        _qnet_kernel,
        out_shape=jax.ShapeDtypeStruct((B, out_size), out_dtype),
        grid_spec=pltpu.PrefetchScalarGridSpec(
            num_scalar_prefetch=0,
            grid=(steps,),
            in_specs=[
                pl.BlockSpec((tb, in_size), lambda i: (i, 0)),      # x: streamed
                pl.BlockSpec((in_size, hid_p), lambda i: (0, 0)),   # W1: resident
                pl.BlockSpec((1, hid_p), lambda i: (0, 0)),         # b1: resident
                pl.BlockSpec((hid_p, out_size), lambda i: (0, 0)),  # W2: resident
                pl.BlockSpec((1, out_size), lambda i: (0, 0)),      # b2: resident
            ],
            out_specs=pl.BlockSpec((tb, out_size), lambda i: (i, 0)),
        ),
        compiler_params=pltpu.CompilerParams(
            dimension_semantics=("parallel",),   # v7x: shard batch across 2 TCs
            vmem_limit_bytes=vmem_limit,         # v5e default scoped is only 16 MiB
        ),
        cost_estimate=cost,
    )(x, w1_p, b1_p, w2_p, b2_p)

    return out[0] if squeeze else out


def init_params(key, input_size, hidden_size, output_size):
    """Deterministic PyTorch-style init: U(-1/sqrt(fan_in), 1/sqrt(fan_in))."""
    k1, k2, k3, k4 = jax.random.split(key, 4)
    bound1 = 1.0 / (input_size ** 0.5)
    bound2 = 1.0 / (hidden_size ** 0.5)
    w1 = jax.random.uniform(k1, (hidden_size, input_size), jnp.float32, -bound1, bound1)
    b1 = jax.random.uniform(k2, (hidden_size,), jnp.float32, -bound1, bound1)
    w2 = jax.random.uniform(k3, (output_size, hidden_size), jnp.float32, -bound2, bound2)
    b2 = jax.random.uniform(k4, (output_size,), jnp.float32, -bound2, bound2)
    return w1, b1, w2, b2


# TODO(synk): Linear_Qnet.save() (torch.save checkpointing) is host-side file
# I/O with no Pallas/kernel equivalent; intentionally not implemented.

if __name__ == "__main__":
    # Canonical Q-net shapes for this module: 11 state features -> 256 -> 3 actions.
    batch, input_size, hidden_size, output_size = 8, 11, 256, 3

    key = jax.random.PRNGKey(0)
    kx, kp = jax.random.split(key)
    x = jax.random.normal(kx, (batch, input_size), jnp.float32)
    w1, b1, w2, b2 = init_params(kp, input_size, hidden_size, output_size)

    # One-time layout/cast/pad of the weights (stored & reused every forward).
    params = prepare_params(w1, b1, w2, b2)
    params = jax.tree_util.tree_map(jax.block_until_ready, params)

    out = linear_qnet_forward(x, params)
    out = jax.block_until_ready(out)
    assert out.shape == (batch, output_size)

    # Reference 1: exactly the bf16-operand / f32-accumulate math the kernel does.
    f32, bf16 = jnp.float32, jnp.bfloat16
    xb = x.astype(bf16).astype(f32)
    w1b = w1.astype(bf16).astype(f32)
    w2b = w2.astype(bf16).astype(f32)
    h_ref = jnp.maximum(xb @ w1b.T + b1, 0.0).astype(bf16).astype(f32)
    ref_bf16 = h_ref @ w2b.T + b2
    assert jnp.allclose(out, ref_bf16, atol=2e-3, rtol=2e-3), (
        f"max abs err vs bf16 reference: {jnp.max(jnp.abs(out - ref_bf16))}")

    # Reference 2: pure-f32 PyTorch math (loose tolerance due to bf16 operands).
    ref_f32 = jnp.maximum(x @ w1.T + b1, 0.0) @ w2.T + b2
    assert jnp.allclose(out, ref_f32, atol=1e-1, rtol=1e-1), (
        f"max abs err vs f32 reference: {jnp.max(jnp.abs(out - ref_f32))}")

    print("KERNEL_OK")
</pallas_src>

<mosaic_0001>
module attributes {stable_mosaic.version = 11 : i64} {
  func.func @_qnet_kernel(%arg0: i32, %arg1: memref<8x11xf32, #tpu.memory_space<vmem>>, %arg2: memref<11x256xbf16, #tpu.memory_space<vmem>>, %arg3: memref<1x256xf32, #tpu.memory_space<vmem>>, %arg4: memref<256x3xbf16, #tpu.memory_space<vmem>>, %arg5: memref<1x3xf32, #tpu.memory_space<vmem>>, %arg6: memref<8x3xf32, #tpu.memory_space<vmem>>) attributes {dimension_semantics = [#tpu.dimension_semantics<parallel>], iteration_bounds = array<i64: 1>, scalar_prefetch = 0 : i64, scratch_operands = 0 : i64, tpu.core_type = #tpu.core_type<tc>, window_params = [{transform_indices = @transform_0, window_bounds = array<i64: 8, 11>}, {pipeline_mode = #tpu.pipeline_mode<synchronous>, transform_indices = @transform_1, window_bounds = array<i64: 11, 256>}, {pipeline_mode = #tpu.pipeline_mode<synchronous>, transform_indices = @transform_2, window_bounds = array<i64: 1, 256>}, {pipeline_mode = #tpu.pipeline_mode<synchronous>, transform_indices = @transform_3, window_bounds = array<i64: 256, 3>}, {pipeline_mode = #tpu.pipeline_mode<synchronous>, transform_indices = @transform_4, window_bounds = array<i64: 1, 3>}, {transform_indices = @transform_5, window_bounds = array<i64: 8, 3>}]} {
    %c0 = arith.constant 0 : index
    %c0_0 = arith.constant 0 : index
    %0 = vector.load %arg1[%c0, %c0_0] : memref<8x11xf32, #tpu.memory_space<vmem>>, vector<8x11xf32>
    %1 = arith.truncf %0 : vector<8x11xf32> to vector<8x11xbf16>
    %c0_1 = arith.constant 0 : index
    %c0_2 = arith.constant 0 : index
    %2 = vector.load %arg2[%c0_1, %c0_2] : memref<11x256xbf16, #tpu.memory_space<vmem>>, vector<11x256xbf16>
    %cst = arith.constant dense<0.000000e+00> : vector<8x256xf32>
    %3 = tpu.matmul %1, %2, %cst {dimension_numbers = #tpu.dot_dimension_numbers<[1], [0], [0], [1], [0, 0, 1, 1], [], []>} : vector<8x11xbf16>, vector<11x256xbf16>, vector<8x256xf32> -> vector<8x256xf32>
    %c0_3 = arith.constant 0 : index
    %c0_4 = arith.constant 0 : index
    %4 = vector.load %arg3[%c0_3, %c0_4] : memref<1x256xf32, #tpu.memory_space<vmem>>, vector<1x256xf32>
    %5 = vector.broadcast %4 : vector<1x256xf32> to vector<8x256xf32>
    %6 = arith.addf %3, %5 : vector<8x256xf32>
    %cst_5 = arith.constant 0.000000e+00 : f32
    %7 = vector.broadcast %cst_5 : f32 to vector<8x256xf32>
    %8 = arith.maximumf %6, %7 : vector<8x256xf32>
    %9 = arith.truncf %8 : vector<8x256xf32> to vector<8x256xbf16>
    %c0_6 = arith.constant 0 : index
    %c0_7 = arith.constant 0 : index
    %10 = vector.load %arg4[%c0_6, %c0_7] : memref<256x3xbf16, #tpu.memory_space<vmem>>, vector<256x3xbf16>
    %cst_8 = arith.constant dense<0.000000e+00> : vector<8x3xf32>
    %11 = tpu.matmul %9, %10, %cst_8 {dimension_numbers = #tpu.dot_dimension_numbers<[1], [0], [0], [1], [0, 0, 1, 1], [], []>} : vector<8x256xbf16>, vector<256x3xbf16>, vector<8x3xf32> -> vector<8x3xf32>
    %c0_9 = arith.constant 0 : index
    %c0_10 = arith.constant 0 : index
    %12 = vector.load %arg5[%c0_9, %c0_10] : memref<1x3xf32, #tpu.memory_space<vmem>>, vector<1x3xf32>
    %13 = vector.broadcast %12 : vector<1x3xf32> to vector<8x3xf32>
    %14 = arith.addf %11, %13 : vector<8x3xf32>
    %c0_11 = arith.constant 0 : index
    %c0_12 = arith.constant 0 : index
    %15 = vector.load %arg6[%c0_11, %c0_12] : memref<8x3xf32, #tpu.memory_space<vmem>>, vector<8x3xf32>
    tpu.vector_store %arg6[%c0_11, %c0_12], %14 {strides = array<i32>} : memref<8x3xf32, #tpu.memory_space<vmem>>, vector<8x3xf32>,
    return
  }
  func.func @transform_0(%arg0: i32) -> (i32, i32) {
    %c0_i32 = arith.constant 0 : i32
    %c0_i32_0 = arith.constant 0 : i32
    return %arg0, %c0_i32 : i32, i32
  }
  func.func @transform_1(%arg0: i32) -> (i32, i32) {
    %c0_i32 = arith.constant 0 : i32
    %c0_i32_0 = arith.constant 0 : i32
    %c0_i32_1 = arith.constant 0 : i32
    return %c0_i32, %c0_i32_0 : i32, i32
  }
  func.func @transform_2(%arg0: i32) -> (i32, i32) {
    %c0_i32 = arith.constant 0 : i32
    %c0_i32_0 = arith.constant 0 : i32
    %c0_i32_1 = arith.constant 0 : i32
    return %c0_i32, %c0_i32_0 : i32, i32
  }
  func.func @transform_3(%arg0: i32) -> (i32, i32) {
    %c0_i32 = arith.constant 0 : i32
    %c0_i32_0 = arith.constant 0 : i32
    %c0_i32_1 = arith.constant 0 : i32
    return %c0_i32, %c0_i32_0 : i32, i32
  }
  func.func @transform_4(%arg0: i32) -> (i32, i32) {
    %c0_i32 = arith.constant 0 : i32
    %c0_i32_0 = arith.constant 0 : i32
    %c0_i32_1 = arith.constant 0 : i32
    return %c0_i32, %c0_i32_0 : i32, i32
  }
  func.func @transform_5(%arg0: i32) -> (i32, i32) {
    %c0_i32 = arith.constant 0 : i32
    %c0_i32_0 = arith.constant 0 : i32
    return %arg0, %c0_i32 : i32, i32
  }
}

</mosaic_0001>

<bundles_post_ra>
// kernel: tpu_custom_call.1
= control target key start
LH: loop header
LB: loop body
LE: loop exit
PB: predicated region body
PF: predicated region fallthrough
CT: control target
= control target key end

     0   :  { %vm49_vm0 = vcmask 1044480   ;;  %vm50_vm1 = vcmask 1045504   ;;  %v348_v1 = vmov 0   ;;  %v349_v2 = vmov 65535   ;;  %s446_s1 = inlined_call_operand.vmem [shape: bf16[11,256], index: 1, kind: input, shape index: {}]   ;;  %s447_s0 = inlined_call_operand.vmem [shape: f32[8,11], index: 0, kind: input, shape index: {}]   ;;  %s448_s3 = inlined_call_operand.vmem [shape: bf16[256,3], index: 3, kind: input, shape index: {}]   ;;  %s449_s2 = inlined_call_operand.vmem [shape: f32[1,256], index: 2, kind: input, shape index: {}]   ;;  %s450_s4 = inlined_call_operand.vmem [shape: f32[1,3], index: 4, kind: input, shape index: {}]   ;;  %s451_s5 = inlined_call_operand.vmem [shape: f32[8,3], index: 5, kind: output, shape index: {}]  }
   0x1   :  { %v329_v0 = vld [vmem:[%s446_s1 + $0x4] ss:$8 sps:$4 sm:$0x3f]   ;;  %91 = vmatprep.mubr.bf16.mxu0 %v348_v1  ;;  %v51_v3 = vsel %vm49_vm0, 4294967295, %v349_v2  ;;  %vm45_vm2 = vcmask 89088   ;;  %v336_v14 = vld [vmem:[%s448_s3 + $0x50] sm:$0xff]   ;;  %v27_v26 = vlaneseq }
   0x2   :  { %v331_v4 = vld [vmem:[%s446_s1] ss:$8 sps:$4 sm:$0x3f]   ;;  %v52_v6 = vsel %vm50_vm1, %v51_v3, 0  ;;  %v337_v15 = vld [vmem:[%s448_s3 + $0x10] sm:$0xff]   ;;  %v338_v16 = vld [vmem:[%s448_s3 + $0x58] sm:$0xff]  }
   0x3   :  { %v21_v5 = vld [vmem:[%s447_s0] sm:$0xff]  ;;  %v57_v8 = vand.u32 %v329_v0, %v52_v6  ;;  %v54_v9 = vand.u32 %v331_v4, %v52_v6  ;;  %v334_v11 = vld [vmem:[%s448_s3 + $0x48] sm:$0xff]   ;;  %v339_v17 = vld [vmem:[%s448_s3 + $0x18] sm:$0xff]   ;;  %v28_v27 = vshrl.u32 %v27_v26, 7  ;;  %vm279_vm3 = vcmask 23552  }
   0x4   :  { %v332_v7 = vld [vmem:[%s448_s3 + $0x40] sm:$0xff]   ;;  %v22_v12 = vpack.c.bf16 %v21_v5, %v21_v5  ;;  %v335_v13 = vld [vmem:[%s448_s3 + $0x8] sm:$0xff]   ;;  %v344_v22 = vld [vmem:[%s448_s3 + $0x70] sm:$0xff]  }
   0x5   :  { %v333_v10 = vld [vmem:[%s448_s3] sm:$0xff]   ;;  %305 = vmatprep.subr.bf16.mxu1 %v332_v7  ;;  %59 = vmatprep.subr.bf16.mxu0 %v57_v8  ;;  %v342_v20 = vld [vmem:[%s448_s3 + $0x68] sm:$0xff]   ;;  %v345_v23 = vld [vmem:[%s448_s3 + $0x30] sm:$0xff]   ;;  %v29_v28 = vsub.s32 0, %v28_v27  ;;  %v33_v30 = vsub.s32 1, %v28_v27 }
   0x6   :  { %306 = vmatpush3.bf16.msra.mxu1 %v333_v10  ;;  %60 = vmatpush1.bf16.msra.mxu0 %v54_v9  ;;  %v340_v18 = vld [vmem:[%s448_s3 + $0x60] sm:$0xff]   ;;  %v343_v21 = vld [vmem:[%s448_s3 + $0x28] sm:$0xff]   ;;  %v346_v24 = vld [vmem:[%s448_s3 + $0x78] sm:$0xff]  }
   0x7   :  { %307 = vmatprep.subr.bf16.mxu1 %v334_v11  ;;  %v341_v19 = vld [vmem:[%s448_s3 + $0x20] sm:$0xff]   ;;  %v347_v25 = vld [vmem:[%s448_s3 + $0x38] sm:$0xff]  }
   0x8   :  { %v25_v29 = vld [vmem:[%s449_s2] sm:$0x3] }
   0x9   :  { %287 = vmatmul.mubr.msk.bf16.vlgmr.msra.gmra.mrb[0].mxu0 %vm45_vm2, %v22_v12  ;;  %v30_v31 = vrot.slane %v25_v29, %v29_v28  ;;  %v34_v32 = vrot.slane %v25_v29, %v33_v30  ;;  %v288_v44 = vld [vmem:[%s450_s4] ss:$0 sm:$0xff] }
   0xa   :  { %308 = vmatpush3.bf16.msra.mxu1 %v335_v13 }
   0xb   :  { %309 = vmatprep.subr.bf16.mxu1 %v336_v14 }
   0xe   :  { %310 = vmatpush3.bf16.msra.mxu1 %v337_v15 }
   0xf   :  { %311 = vmatprep.subr.bf16.mxu1 %v338_v16 }
  0x12   :  { %312 = vmatpush3.bf16.msra.mxu1 %v339_v17 }
  0x13   :  { %313 = vmatprep.subr.bf16.mxu1 %v340_v18 }
  0x16   :  { %314 = vmatpush3.bf16.msra.mxu1 %v341_v19 }
  0x17   :  { %315 = vmatprep.subr.bf16.mxu1 %v342_v20 }
  0x1a   :  { %316 = vmatpush3.bf16.msra.mxu1 %v343_v21 }
  0x1b   :  { %317 = vmatprep.subr.bf16.mxu1 %v344_v22 }
  0x1e   :  { %318 = vmatpush3.bf16.msra.mxu1 %v345_v23 }
  0x1f   :  { %319 = vmatprep.subr.bf16.mxu1 %v346_v24 }
  0x22   :  { %320 = vmatpush3.bf16.msra.mxu1 %v347_v25 }
  0xdc   :  { %v93_v33 = vpop.f32.mrb[0].mxu0 }
  0xdd   :  { %v94_v34 = vadd.f32 %v93_v33, %v30_v31  ;;  %v95_v35 = vpop.f32.mrb[1].mxu0 }
  0xde   :  { %v96_v36 = vadd.f32 %v95_v35, %v34_v32  ;;  %v97_v37 = vpop.f32.mrb[2].mxu0 }
  0xdf   :  { %v100_v38 = vmax.f32 %v94_v34, 0.0  ;;  %v98_v39 = vpop.f32.mrb[3].mxu0 }
  0xe0   :  { %v101_v40 = vmax.f32 %v96_v36, 0.0 }
  0xe1   :  { %v102_v42 = vpack.c.bf16 %v100_v38, %v100_v38 }
  0xe2   :  { %v103_v41 = vpack.c.bf16 %v101_v40, %v101_v40 }
  0xe4   :  { %271 = vmatprep.mubr.bf16.mxu1 %v103_v41 }
  0xe5   :  { %272 = vmatmul.mubr.bf16.vlgmr.msra.gmra.mrb[0].mxu1 %v102_v42 }
 0x1b8   :  { %v321_v43 = vpop.f32.mrb[0].mxu1 }
 0x1b9   :  { %v322_v45 = vpop.f32.mrb[1].mxu1 }
 0x1ba   :  { %v323_v46 = vadd.f32 %v322_v45, %v321_v43  ;;  %v324_v47 = vpop.f32.mrb[2].mxu1 }
 0x1bb   :  { %v325_v48 = vpop.f32.mrb[3].mxu1 }
 0x1bc   :  { %v274_v49 = vadd.f32 %v323_v46, %v288_v44 }
 0x1be   :  { %280 = vst.msk [vmem:[%s451_s5] sm:$0xff] %vm279_vm3, %v274_v49 }

</bundles_post_ra>
